<compile_context>
chip_gen: v5e
topology: v5e:2x2
jax: 0.10.0
libtpu: 0.0.40
codegen_flags: <defaults>
</compile_context>

<pallas_src>
import functools
import math

import jax
import jax.numpy as jnp
from jax.experimental import pallas as pl
from jax.experimental.pallas import tpu as pltpu


def _linear_mse_kernel(x_ref, w_ref, b_ref, xp_ref, y_ref, loss_ref, *,
                       tb, matmul_dtype):
    # x_ref  : (Tb, L, Tc)   w_ref : (P, L)   b_ref : (P, 1)
    # xp_ref : (Tb, P, Tc)   y_ref : (Tb, P, Tc)   loss_ref : (1, 1, 1)
    c = pl.program_id(1)

    @pl.when(c == 0)
    def _():
        loss_ref[...] = jnp.zeros_like(loss_ref)

    mm_dtype = jnp.float32 if matmul_dtype is None else matmul_dtype
    w = w_ref[...].astype(mm_dtype)            # (P, L), VMEM-resident
    bias = b_ref[...].astype(jnp.float32)      # (P, 1), broadcasts over lanes

    sse = jnp.zeros((), jnp.float32)
    # Short static unroll over the fused batch elements of this block.
    for bi in range(tb):
        xb = x_ref[bi].astype(mm_dtype)                                   # (L, Tc)
        yb = jnp.dot(w, xb, preferred_element_type=jnp.float32) + bias    # (P, Tc)
        y_ref[bi] = yb.astype(y_ref.dtype)                                # lane-dense store
        diff = yb - xp_ref[bi].astype(jnp.float32)
        sse = sse + jnp.sum(diff * diff)

    # VMEM-resident accumulator across the (arbitrary) C-tile axis; one HBM
    # write-back per batch tile.
    loss_ref[...] += jnp.reshape(sse, (1, 1, 1))


def _pick_tiles(B, L, P, Cp, x_bytes, xp_bytes, y_bytes,
                stream_budget_bytes=10 * 2**20):
    """Choose (Tb, Tc): batch-fusion factor and lane (channel) tile size.

    Keeps the double-buffered streaming footprint under `stream_budget_bytes`
    (conservative for v7x's 64 MiB VMEM) and, for B >= 2, leaves at least two
    batch tiles so the 'parallel' grid axis feeds both v7x TensorCores.
    """
    tb_cap = min(8, B if B < 2 else max(1, B // 2))
    tb = 1
    for cand in range(min(tb_cap, B), 0, -1):
        if B % cand == 0:
            tb = cand
            break

    def stream(tb_, tc_):
        # x + x_pred + y tiles, double-buffered by the pipeline.
        return 2 * tc_ * tb_ * (L * x_bytes + P * xp_bytes + P * y_bytes)

    tc = Cp
    while tc > 128 and (Cp % tc != 0 or stream(tb, tc) > stream_budget_bytes):
        tc -= 128
    while tb > 1 and stream(tb, tc) > stream_budget_bytes:
        tb -= 1
        while B % tb != 0:
            tb -= 1
    return tb, tc


def linear_pred_forward(x, x_pred, weight, bias, *, is_norm=False,
                        matmul_dtype=None):
    """Replicates LinearPred.forward (is_norm=False path).

    x      : (B, input_len, C)
    x_pred : (B, pred_len,  C)
    weight : (pred_len, input_len)    (PyTorch nn.Linear layout)
    bias   : (pred_len,)
    Returns (loss, y) with y of shape (B, pred_len, C), float32.

    matmul_dtype=jnp.bfloat16 is opt-in (changes numerics vs the f32 PyTorch
    reference); accumulation stays in f32 via preferred_element_type.
    """
    if is_norm:
        # TODO(synk): instance_norm / instance_denorm are not defined in the
        # reference source; only the is_norm=False path is implemented.
        raise NotImplementedError("instance_norm not defined in reference module")

    B, L, C = x.shape
    P = weight.shape[0]
    assert x_pred.shape == (B, P, C)
    assert weight.shape == (P, L)

    wf = weight.astype(jnp.float32)                 # (P, L)
    bf = bias.astype(jnp.float32).reshape(P, 1)     # (P, 1)

    # --- channel padding to a lane multiple (128) ------------------------------
    Cp = ((C + 127) // 128) * 128
    if Cp != C:
        pad = Cp - C
        # Padded x columns are zero -> y there equals the bias exactly; pad
        # x_pred with the bias so those columns contribute 0 to the SSE.
        # (If x_pred is narrower than f32 the cast makes this ~0 rather than
        # exactly 0; negligible and absent whenever C % 128 == 0.)
        x_in = jnp.pad(x, ((0, 0), (0, 0), (0, pad)))
        fill = jnp.broadcast_to(bf.reshape(1, P, 1), (B, P, pad)).astype(x_pred.dtype)
        xp_in = jnp.concatenate([x_pred, fill], axis=-1)
    else:
        x_in, xp_in = x, x_pred

    x_bytes = jnp.dtype(x_in.dtype).itemsize
    xp_bytes = jnp.dtype(xp_in.dtype).itemsize
    y_bytes = 4  # y is emitted in f32 (PyTorch parity)

    tb, tile_c = _pick_tiles(B, L, P, Cp, x_bytes, xp_bytes, y_bytes)
    nb = B // tb
    nc = Cp // tile_c
    grid = (nb, nc)

    # --- VMEM budget (counts the pipeline's second copy of weight/bias) --------
    stream_bytes = 2 * tile_c * tb * (L * x_bytes + P * xp_bytes + P * y_bytes)
    resident_bytes = 2 * 4 * (P * L + P)       # weight + bias, double-buffered
    loss_bytes = 2 * 8 * 128 * 4               # padded (1,1,1) loss tile, x2 buffers
    vmem_est = stream_bytes + resident_bytes + loss_bytes
    vmem_limit = int(max(min(2 * vmem_est, 32 * 2**20),
                         vmem_est + (1 << 20), 8 * 2**20))

    flops = 2 * B * Cp * L * P
    bytes_accessed = (B * L * Cp * x_bytes + B * P * Cp * xp_bytes
                      + B * P * Cp * y_bytes + 4 * (P * L + P) + 4 * nb)

    kernel = functools.partial(_linear_mse_kernel, tb=tb, matmul_dtype=matmul_dtype)

    y, loss_parts = pl.pallas_call(
        kernel,
        out_shape=(
            jax.ShapeDtypeStruct((B, P, Cp), jnp.float32),
            jax.ShapeDtypeStruct((nb, 1, 1), jnp.float32),
        ),
        grid=grid,
        in_specs=[
            pl.BlockSpec((tb, L, tile_c), lambda b, c: (b, 0, c)),   # x tile
            pl.BlockSpec((P, L), lambda b, c: (0, 0)),               # weight (resident)
            pl.BlockSpec((P, 1), lambda b, c: (0, 0)),               # bias   (resident)
            pl.BlockSpec((tb, P, tile_c), lambda b, c: (b, 0, c)),   # x_pred tile
        ],
        out_specs=(
            pl.BlockSpec((tb, P, tile_c), lambda b, c: (b, 0, c)),   # y tile
            pl.BlockSpec((1, 1, 1), lambda b, c: (b, 0, 0)),         # SSE accumulator
        ),
        compiler_params=pltpu.CompilerParams(
            dimension_semantics=("parallel", "arbitrary"),
            vmem_limit_bytes=vmem_limit,
        ),
        cost_estimate=pl.CostEstimate(
            flops=flops, transcendentals=0, bytes_accessed=bytes_accessed),
    )(x_in, wf, bf, xp_in)

    loss = jnp.sum(loss_parts) / (B * P * C)
    if Cp != C:
        y = y[:, :, :C]
    return loss, y


if __name__ == "__main__":
    # Small shapes consistent with the module's forward: x is (B, input_len, C).
    # C is a multiple of 128 since it is the streaming lane axis.
    B, C = 4, 256
    input_len, pred_len = 32, 16

    key = jax.random.PRNGKey(0)
    kx, kxp, kw, kb = jax.random.split(key, 4)

    x = jax.random.normal(kx, (B, input_len, C), dtype=jnp.float32)
    x_pred = jax.random.normal(kxp, (B, pred_len, C), dtype=jnp.float32)

    # Deterministic nn.Linear-style init: U(-1/sqrt(in), 1/sqrt(in)).
    bound = 1.0 / math.sqrt(input_len)
    weight = jax.random.uniform(kw, (pred_len, input_len), jnp.float32, -bound, bound)
    bias = jax.random.uniform(kb, (pred_len,), jnp.float32, -bound, bound)

    loss, y = linear_pred_forward(x, x_pred, weight, bias, is_norm=False)
    loss, y = jax.block_until_ready((loss, y))

    # Reference check in plain JAX (same math as the PyTorch forward).
    y_ref = jnp.einsum("blc,pl->bpc", x, weight) + bias[None, :, None]
    loss_ref = jnp.mean((y_ref - x_pred) ** 2)
    assert y.shape == (B, pred_len, C), "shape mismatch"
    assert jnp.allclose(y, y_ref, atol=1e-4, rtol=1e-4), "output mismatch"
    assert jnp.allclose(loss, loss_ref, atol=1e-4, rtol=1e-4), "loss mismatch"

    print("KERNEL_OK")
</pallas_src>

<mosaic_0001>
module attributes {stable_mosaic.version = 11 : i64} {
  func.func @_linear_mse_kernel(%arg0: i32, %arg1: i32, %arg2: memref<2x32x256xf32, #tpu.memory_space<vmem>>, %arg3: memref<16x32xf32, #tpu.memory_space<vmem>>, %arg4: memref<16x1xf32, #tpu.memory_space<vmem>>, %arg5: memref<2x16x256xf32, #tpu.memory_space<vmem>>, %arg6: memref<2x16x256xf32, #tpu.memory_space<vmem>>, %arg7: memref<1x1x1xf32, #tpu.memory_space<vmem>>) attributes {dimension_semantics = [#tpu.dimension_semantics<parallel>, #tpu.dimension_semantics<arbitrary>], iteration_bounds = array<i64: 2, 1>, scalar_prefetch = 0 : i64, scratch_operands = 0 : i64, tpu.core_type = #tpu.core_type<tc>, window_params = [{transform_indices = @transform_0, window_bounds = array<i64: 2, 32, 256>}, {pipeline_mode = #tpu.pipeline_mode<synchronous>, transform_indices = @transform_1, window_bounds = array<i64: 16, 32>}, {pipeline_mode = #tpu.pipeline_mode<synchronous>, transform_indices = @transform_2, window_bounds = array<i64: 16, 1>}, {transform_indices = @transform_3, window_bounds = array<i64: 2, 16, 256>}, {transform_indices = @transform_4, window_bounds = array<i64: 2, 16, 256>}, {transform_indices = @transform_5, window_bounds = array<i64: 1, 1, 1>}]} {
    %c0_i32 = arith.constant 0 : i32
    %0 = arith.cmpi eq, %arg1, %c0_i32 : i32
    %1 = arith.extui %0 : i1 to i32
    %c0_i32_0 = arith.constant 0 : i32
    %2 = arith.cmpi ne, %1, %c0_i32_0 : i32
    scf.if %2 {
      %cst_31 = arith.constant 0.000000e+00 : f32
      %43 = vector.broadcast %cst_31 : f32 to vector<1x1x1xf32>
      %c0_32 = arith.constant 0 : index
      %c0_33 = arith.constant 0 : index
      %c0_34 = arith.constant 0 : index
      %44 = vector.load %arg7[%c0_32, %c0_33, %c0_34] : memref<1x1x1xf32, #tpu.memory_space<vmem>>, vector<1x1x1xf32>
      tpu.vector_store %arg7[%c0_32, %c0_33, %c0_34], %43 {strides = array<i32>} : memref<1x1x1xf32, #tpu.memory_space<vmem>>, vector<1x1x1xf32>,
    } else {
    }
    %c0 = arith.constant 0 : index
    %c0_1 = arith.constant 0 : index
    %3 = vector.load %arg3[%c0, %c0_1] : memref<16x32xf32, #tpu.memory_space<vmem>>, vector<16x32xf32>
    %c0_2 = arith.constant 0 : index
    %c0_3 = arith.constant 0 : index
    %4 = vector.load %arg4[%c0_2, %c0_3] : memref<16x1xf32, #tpu.memory_space<vmem>>, vector<16x1xf32>
    %c0_4 = arith.constant 0 : index
    %c0_5 = arith.constant 0 : index
    %c0_6 = arith.constant 0 : index
    %5 = vector.load %arg2[%c0_4, %c0_5, %c0_6] : memref<2x32x256xf32, #tpu.memory_space<vmem>>, vector<1x32x256xf32>
    %6 = vector.shape_cast %5 : vector<1x32x256xf32> to vector<32x256xf32>
    %cst = arith.constant dense<0.000000e+00> : vector<16x256xf32>
    %7 = tpu.matmul %3, %6, %cst {dimension_numbers = #tpu.dot_dimension_numbers<[1], [0], [0], [1], [0, 0, 1, 1], [], []>} : vector<16x32xf32>, vector<32x256xf32>, vector<16x256xf32> -> vector<16x256xf32>
    %8 = vector.broadcast %4 : vector<16x1xf32> to vector<16x256xf32>
    %9 = arith.addf %7, %8 : vector<16x256xf32>
    %c0_7 = arith.constant 0 : index
    %c0_8 = arith.constant 0 : index
    %c0_9 = arith.constant 0 : index
    %10 = vector.load %arg6[%c0_7, %c0_8, %c0_9] : memref<2x16x256xf32, #tpu.memory_space<vmem>>, vector<1x16x256xf32>
    %11 = vector.shape_cast %10 : vector<1x16x256xf32> to vector<16x256xf32>
    %12 = vector.shape_cast %9 : vector<16x256xf32> to vector<1x16x256xf32>
    tpu.vector_store %arg6[%c0_7, %c0_8, %c0_9], %12 {strides = array<i32>} : memref<2x16x256xf32, #tpu.memory_space<vmem>>, vector<1x16x256xf32>,
    %c0_10 = arith.constant 0 : index
    %c0_11 = arith.constant 0 : index
    %c0_12 = arith.constant 0 : index
    %13 = vector.load %arg5[%c0_10, %c0_11, %c0_12] : memref<2x16x256xf32, #tpu.memory_space<vmem>>, vector<1x16x256xf32>
    %14 = vector.shape_cast %13 : vector<1x16x256xf32> to vector<16x256xf32>
    %15 = arith.subf %9, %14 : vector<16x256xf32>
    %16 = arith.mulf %15, %15 : vector<16x256xf32>
    %17 = vector.shape_cast %16 : vector<16x256xf32> to vector<1x16x256xf32>
    %cst_13 = arith.constant dense<0.000000e+00> : vector<1xf32>
    %18 = vector.multi_reduction <add>, %17, %cst_13 [1, 2] : vector<1x16x256xf32> to vector<1xf32>
    %19 = vector.shape_cast %18 : vector<1xf32> to vector<1x1x1xf32>
    %20 = vector.extract %19[0, 0, 0] : f32 from vector<1x1x1xf32>
    %cst_14 = arith.constant 0.000000e+00 : f32
    %21 = arith.addf %cst_14, %20 : f32
    %c1 = arith.constant 1 : index
    %c0_15 = arith.constant 0 : index
    %c0_16 = arith.constant 0 : index
    %22 = vector.load %arg2[%c1, %c0_15, %c0_16] : memref<2x32x256xf32, #tpu.memory_space<vmem>>, vector<1x32x256xf32>
    %23 = vector.shape_cast %22 : vector<1x32x256xf32> to vector<32x256xf32>
    %cst_17 = arith.constant dense<0.000000e+00> : vector<16x256xf32>
    %24 = tpu.matmul %3, %23, %cst_17 {dimension_numbers = #tpu.dot_dimension_numbers<[1], [0], [0], [1], [0, 0, 1, 1], [], []>} : vector<16x32xf32>, vector<32x256xf32>, vector<16x256xf32> -> vector<16x256xf32>
    %25 = vector.broadcast %4 : vector<16x1xf32> to vector<16x256xf32>
    %26 = arith.addf %24, %25 : vector<16x256xf32>
    %c1_18 = arith.constant 1 : index
    %c0_19 = arith.constant 0 : index
    %c0_20 = arith.constant 0 : index
    %27 = vector.load %arg6[%c1_18, %c0_19, %c0_20] : memref<2x16x256xf32, #tpu.memory_space<vmem>>, vector<1x16x256xf32>
    %28 = vector.shape_cast %27 : vector<1x16x256xf32> to vector<16x256xf32>
    %29 = vector.shape_cast %26 : vector<16x256xf32> to vector<1x16x256xf32>
    tpu.vector_store %arg6[%c1_18, %c0_19, %c0_20], %29 {strides = array<i32>} : memref<2x16x256xf32, #tpu.memory_space<vmem>>, vector<1x16x256xf32>,
    %c1_21 = arith.constant 1 : index
    %c0_22 = arith.constant 0 : index
    %c0_23 = arith.constant 0 : index
    %30 = vector.load %arg5[%c1_21, %c0_22, %c0_23] : memref<2x16x256xf32, #tpu.memory_space<vmem>>, vector<1x16x256xf32>
    %31 = vector.shape_cast %30 : vector<1x16x256xf32> to vector<16x256xf32>
    %32 = arith.subf %26, %31 : vector<16x256xf32>
    %33 = arith.mulf %32, %32 : vector<16x256xf32>
    %34 = vector.shape_cast %33 : vector<16x256xf32> to vector<1x16x256xf32>
    %cst_24 = arith.constant dense<0.000000e+00> : vector<1xf32>
    %35 = vector.multi_reduction <add>, %34, %cst_24 [1, 2] : vector<1x16x256xf32> to vector<1xf32>
    %36 = vector.shape_cast %35 : vector<1xf32> to vector<1x1x1xf32>
    %37 = vector.extract %36[0, 0, 0] : f32 from vector<1x1x1xf32>
    %38 = arith.addf %21, %37 : f32
    %c0_25 = arith.constant 0 : index
    %c0_26 = arith.constant 0 : index
    %c0_27 = arith.constant 0 : index
    %39 = vector.load %arg7[%c0_25, %c0_26, %c0_27] : memref<1x1x1xf32, #tpu.memory_space<vmem>>, vector<1x1x1xf32>
    %40 = vector.broadcast %38 : f32 to vector<1x1x1xf32>
    %41 = arith.addf %39, %40 : vector<1x1x1xf32>
    %c0_28 = arith.constant 0 : index
    %c0_29 = arith.constant 0 : index
    %c0_30 = arith.constant 0 : index
    %42 = vector.load %arg7[%c0_28, %c0_29, %c0_30] : memref<1x1x1xf32, #tpu.memory_space<vmem>>, vector<1x1x1xf32>
    tpu.vector_store %arg7[%c0_28, %c0_29, %c0_30], %41 {strides = array<i32>} : memref<1x1x1xf32, #tpu.memory_space<vmem>>, vector<1x1x1xf32>,
    return
  }
  func.func @transform_0(%arg0: i32, %arg1: i32) -> (i32, i32, i32) {
    %c0_i32 = arith.constant 0 : i32
    %c0_i32_0 = arith.constant 0 : i32
    return %arg0, %c0_i32, %arg1 : i32, i32, i32
  }
  func.func @transform_1(%arg0: i32, %arg1: i32) -> (i32, i32) {
    %c0_i32 = arith.constant 0 : i32
    %c0_i32_0 = arith.constant 0 : i32
    %c0_i32_1 = arith.constant 0 : i32
    return %c0_i32, %c0_i32_0 : i32, i32
  }
  func.func @transform_2(%arg0: i32, %arg1: i32) -> (i32, i32) {
    %c0_i32 = arith.constant 0 : i32
    %c0_i32_0 = arith.constant 0 : i32
    %c0_i32_1 = arith.constant 0 : i32
    return %c0_i32, %c0_i32_0 : i32, i32
  }
  func.func @transform_3(%arg0: i32, %arg1: i32) -> (i32, i32, i32) {
    %c0_i32 = arith.constant 0 : i32
    %c0_i32_0 = arith.constant 0 : i32
    return %arg0, %c0_i32, %arg1 : i32, i32, i32
  }
  func.func @transform_4(%arg0: i32, %arg1: i32) -> (i32, i32, i32) {
    %c0_i32 = arith.constant 0 : i32
    %c0_i32_0 = arith.constant 0 : i32
    return %arg0, %c0_i32, %arg1 : i32, i32, i32
  }
  func.func @transform_5(%arg0: i32, %arg1: i32) -> (i32, i32, i32) {
    %c0_i32 = arith.constant 0 : i32
    %c0_i32_0 = arith.constant 0 : i32
    %c0_i32_1 = arith.constant 0 : i32
    return %arg0, %c0_i32, %c0_i32_0 : i32, i32, i32
  }
}

</mosaic_0001>

<bundles_post_ra>
// kernel: tpu_custom_call.1
= control target key start
LH: loop header
LB: loop body
LE: loop exit
PB: predicated region body
PF: predicated region fallthrough
CT: control target
= control target key end

     0   :  { %s1210_s0 = inlined_call_operand.hbm [shape: f32[4,32,256], index: 0, kind: input, shape index: {}]   ;;  %s1211_s1 = inlined_call_operand.vmem [shape: f32[16,32], index: 1, kind: input, shape index: {}]   ;;  %s1212_s2 = inlined_call_operand.vmem [shape: f32[16,1], index: 2, kind: input, shape index: {}]   ;;  %s1213_s3 = inlined_call_operand.hbm [shape: f32[4,16,256], index: 3, kind: input, shape index: {}]   ;;  %s1214_s4 = inlined_call_operand.hbm [shape: f32[4,16,256], index: 4, kind: output, shape index: {0}]   ;;  %s1215_s5 = inlined_call_operand.vmem [shape: f32[2,1,1], index: 5, kind: output, shape index: {1}]  }
   0x1   :  { %1218 = sst [smem:[#allocation13_spill]] %s1210_s0 }
   0x2   :  { %11 = vsyncpa [#allocation3], 0 }
   0x3   :  { %13 = vsyncpa [#allocation3 + $0x1], 0 }
   0x4   :  { %14 = vsyncpa [#allocation6], 0 }
   0x5   :  { %16 = vsyncpa [#allocation6 + $0x1], 0 }
   0x6   :  { %17 = vsyncpa [#allocation4], 0 }
   0x7   :  { %19 = vsyncpa [#allocation4 + $0x1], 0  ;;  %s998_s18 = smov 0   ;;  %s1000_s19 = smov 0  }
   0x8   :  { %s1002_s20 = smov 0   ;;  %s1004_s21 = smov 0  }
   0x9   :  { %s1006_s22 = smov 0   ;;  %s1008_s23 = smov 0  }
   0xa LB: > { %1219 = sst [smem:[#allocation11_spill]] %s956_s22  ;;  %s684_s24 = sadd.s32 4294967295, %s960_s23   ;;  %s960_s23 = sphi %s1008_s23, %s25_s23   ;;  %s956_s22 = sphi %s1006_s22, %s1228_s22   ;;  %s952_s21 = sphi %s1004_s21, %s1227_s21   ;;  %s948_s20 = sphi %s1002_s20, %s1231_s20   ;;  %s944_s19 = sphi %s1000_s19, %s1230_s19   ;;  %s940_s18 = sphi %s998_s18, %s1229_s18  }
   0xb   : > { %s685_s25 = sadd.s32 4294967294, %s960_s23   ;;  %s37_s26 = sadd.s32 1, %s956_s22 }
   0xc   : > { %s46_s27 = sadd.s32 1, %s948_s20  ;;  %p39_p0 = scmp.ge.s32.totalorder %s37_s26, 2 }
   0xd   : > { %p53_p1 = scmp.ne.s32.totalorder %s948_s20, %s944_s19  ;;  %p54_p2 = scmp.eq.s32.totalorder %s960_s23, 0 }
   0xe   : > { %p59_p3 = scmp.ne.s32.totalorder %s944_s19, %s940_s18  ;;  %s1233_s26 = smov (%p39_p0, %s37_s26), 0 }
   0xf   : > { %1220 = sst [smem:[#allocation12_spill]] %s1233_s26  ;;  %p1039_p4 = por %p54_p2, %p53_p1 }
  0x10   : > { %p60_p5 = scmp.eq.s32.totalorder %s684_s24, 0  ;;  %s41_s29 = ssub.s32 %s956_s22, %s1233_s26 }
  0x11   : > { %p155_p6 = scmp.eq.s32.totalorder %s684_s24, 1  ;;  %p44_p7 = scmp.eq.s32.totalorder %s41_s29, 0 }
  0x12   : > { %p1045_p8 = por %p60_p5, %p59_p3  ;;  %p161_p10 = scmp.eq.s32.totalorder %s685_s25, 1 }
  0x13   : > { %p1049_p9 = por %p155_p6, %p53_p1  ;;  %p687_p12 = scmp.ge.s32.totalorder %s960_s23, 2 }
  0x14   : > { %s1054_s7 = scalar_select %p44_p7, %s948_s20, %s46_s27  }
  0x15   : > { %p1056_p11 = por %p161_p10, %p59_p3  ;;  %p757_p13 = scmp.lt.s32.totalorder %s960_s23, 2 }
  0x16   : > { %s1063_s9 = sand.u32 1, %s948_s20   ;;  %s731_s11 = sshll.u32 %s956_s22, 7 }
  0x17   : > { %s688_s10 = sshll.u32 %s1063_s9, 7  ;;  %s1225_s0 = sld [smem:[#allocation13_spill]] }
  0x18   : > { %s217_s15 = scalar_lea.vmem [#allocation2], %s688_s10  ;;  %p1072_p0 = pnand %p757_p13, %p1039_p4 }
  0x19   : > { %s228_s16 = sshll.u32 %s217_s15, 4  ;;  %p696_p1 = scmp.ge.s32.totalorder %s960_s23, 1  ;;  %s229_s16 = int_to_ptr.vmem [resolvable:$true] %s228_s16 }
  0x1a   : > { %s214_s25 = scalar_lea.sflag [#allocation3], %s1063_s9  ;;  %s962_s27 = smov 256  }
  0x1b   : > { %s963_s29 = smov 16   ;;  %p261_p2 = scmp.lt.s32.totalorder %s960_s23, 3 }
  0x1c   : > { %s692_s10 = sshll.u32 %s1063_s9, 6  ;;  %s239_s26 = scalar_lea.sflag [#allocation6], %s1063_s9 }
  0x1d   : > { %s225_s14 = scalar_lea.hbm %s1225_s0, %s731_s11  ;;  %s733_s11 = sshll.u32 %s956_s22, 6 }
  0x1e   : > { %s226_s17 = sshll.u32 %s225_s14, 4  ;;  %p262_p3 = pnand %p696_p1, %p261_p2  ;;  %s227_s17 = int_to_ptr.hbm [resolvable:$true] %s226_s17 }
  0x1f   : > { %749 = dma.hbm_to_vmem [thread:$0]  (!%p1072_p0), %s227_s17, 2048, %s229_s16, %s214_s25, %s962_s27, %s962_s27, %s963_s29  }
  0x20   : > { %s250_s28 = scalar_lea.hbm %s1213_s3, %s733_s11  ;;  %s242_s14 = scalar_lea.vmem [#allocation5], %s692_s10 }
  0x21   : > { %s253_s15 = sshll.u32 %s242_s14, 4  ;;  %s251_s0 = sshll.u32 %s250_s28, 4  ;;  %s254_s15 = int_to_ptr.vmem [resolvable:$true] %s253_s15  ;;  %s252_s0 = int_to_ptr.hbm [resolvable:$true] %s251_s0 }
  0x22   : > { %752 = dma.hbm_to_vmem [thread:$0]  (!%p1072_p0), %s252_s0, 1024, %s254_s15, %s239_s26, %s962_s27, %s962_s27, %s963_s29  }
  0x23   : > { %265 = sbr.rel (%p262_p3) target bundleno = 389 (0x185), region = 36  ;;  %s1090_s16 = sand.u32 (!%p262_p3), 1, %s944_s19  }
  0x24   : > { %s697_s17 = sshll.u32 (!%p262_p3), %s1090_s16, 7  ;;  %s268_s25 = scalar_lea.sflag (!%p262_p3), [#allocation3], %s1090_s16 }
  0x25   : > { %s1094_s22 = scalar_lea.vmem (!%p262_p3), [#allocation2], %s697_s17 }
  0x28   : > { %927 = dma.done.wait (%p1045_p8), %s268_s25, 2048  }
  0x29   : > { %929 = vsyncadd (%p1045_p8), %s268_s25, 4294965248  ;;  %s698_s0 = sshll.u32 %s1090_s16, 6  ;;  %s278_s26 = scalar_lea.sflag [#allocation6], %s1090_s16 }
  0x2a   : > { %s1104_s9 = scalar_lea.vmem [#allocation5], %s698_s0 }
  0x2b   : > { %931 = dma.done.wait (%p1045_p8), %s278_s26, 1024  }
  0x2c   : > { %933 = vsyncadd (%p1045_p8), %s278_s26, 4294966272  ;;  %v964_v0 = vmov 0   ;;  %v342_v1 = vld [vmem:[%s1094_s22 + $0x30] sm:$0xff]  ;;  %v343_v2 = vld [vmem:[%s1094_s22 + $0x38] sm:$0xff]  ;;  %vm354_vm0 = vcmask 261120   ;;  %s1150_s13 = scalar_lea.vmem [#allocation7], %s698_s0 }
  0x2d   : > { %813 = vset.pattern.permute.xlu0 %v964_v0  ;;  %v710_v3 = vld [vmem:[%s1094_s22 + $0x70] sm:$0xff]  ;;  %373 = vmatpush.msra.mxu0 %v342_v1  ;;  %v711_v4 = vld [vmem:[%s1094_s22 + $0x78] sm:$0xff]  ;;  %v340_v5 = vld [vmem:[%s1094_s22 + $0x20] sm:$0xff]  ;;  %s546_s28 = sshll.u32 %s1150_s13, 4  ;;  %s735_s14 = sshll.u32 %s952_s21, 6  ;;  %s547_s28 = int_to_ptr.vmem [resolvable:$true] %s546_s28 }
  0x2e   : > { %396 = vmatpush.msra.mxu1 %v343_v2  ;;  %v341_v6 = vld [vmem:[%s1094_s22 + $0x28] sm:$0xff]  ;;  %457 = vmatpush.msra.mxu2 %v710_v3  ;;  %v708_v7 = vld [vmem:[%s1094_s22 + $0x60] sm:$0xff]  ;;  %v338_v9 = vld [vmem:[%s1094_s22 + $0x10] sm:$0xff]  ;;  %s545_s25 = scalar_lea.hbm %s1214_s4, %s735_s14  ;;  %s528_s26 = scalar_lea.sflag [#allocation4], %s1090_s16 }
  0x2f   : > { %480 = vmatpush.msra.mxu3 %v711_v4  ;;  %v709_v8 = vld [vmem:[%s1094_s22 + $0x68] sm:$0xff]  ;;  %374 = vmatpush.msra.mxu0 %v340_v5  ;;  %v339_v10 = vld [vmem:[%s1094_s22 + $0x18] sm:$0xff]  ;;  %v706_v11 = vld [vmem:[%s1094_s22 + $0x50] sm:$0xff]  ;;  %s548_s0 = sshll.u32 %s545_s25, 4  ;;  %s894_s29 = scalar_lea.hbm %s1214_s4, 128  ;;  %s549_s0 = int_to_ptr.hbm [resolvable:$true] %s548_s0 }
  0x30   : > { %397 = vmatpush.msra.mxu1 %v341_v6  ;;  %v707_v12 = vld [vmem:[%s1094_s22 + $0x58] sm:$0xff]  ;;  %458 = vmatpush.msra.mxu2 %v708_v7  ;;  %v336_v13 = vld [vmem:[%s1094_s22] sm:$0xff]  ;;  %v337_v14 = vld [vmem:[%s1094_s22 + $0x8] sm:$0xff] }
  0x31   : > { %481 = vmatpush.msra.mxu3 %v709_v8  ;;  %375 = vmatpush.msra.mxu0 %v338_v9  ;;  %v704_v15 = vld [vmem:[%s1094_s22 + $0x40] sm:$0xff]  ;;  %v705_v16 = vld [vmem:[%s1094_s22 + $0x48] sm:$0xff]  ;;  %v413_v36 = vld [vmem:[%s1104_s9 + $0x10] sm:$0xff] }
  0x32   : > { %398 = vmatpush.msra.mxu1 %v339_v10  ;;  %459 = vmatpush.msra.mxu2 %v706_v11  ;;  %v332_v17 = vld [vmem:[%s1211_s1] sm:$0xff]  ;;  %v333_v19 = vld [vmem:[%s1211_s1 + $0x8] sm:$0xff]  ;;  %v414_v38 = vld [vmem:[%s1104_s9 + $0x18] sm:$0xff] }
  0x33   : > { %482 = vmatpush.msra.mxu3 %v707_v12  ;;  %376 = vmatpush.msra.mxu0 %v336_v13  ;;  %v334_v18 = vld [vmem:[%s1212_s2] sm:$0xff]  ;;  %v335_v20 = vld [vmem:[%s1212_s2 + $0x8] sm:$0xff]  ;;  %v722_v52 = vld [vmem:[%s1104_s9 + $0x30] sm:$0xff] }
  0x34   : > { %399 = vmatpush.msra.mxu1 %v337_v14  ;;  %460 = vmatpush.msra.mxu2 %v704_v15  ;;  %v411_v26 = vld [vmem:[%s1104_s9] sm:$0xff]  ;;  %v412_v27 = vld [vmem:[%s1104_s9 + $0x8] sm:$0xff]  ;;  %v723_v60 = vld [vmem:[%s1104_s9 + $0x38] sm:$0xff] }
  0x35   : > { %483 = vmatpush.msra.mxu3 %v705_v16  ;;  %700 = vmatmul.msk.f32.vlgmr.msra.gmra.mxu0 %vm354_vm0, %v332_v17  ;;  %v720_v41 = vld [vmem:[%s1104_s9 + $0x20] sm:$0xff]  ;;  %v721_v42 = vld [vmem:[%s1104_s9 + $0x28] sm:$0xff]  ;;  %s888_s9 = sshra.s32 %s549_s0, 4  ;;  %s889_s9 = int_to_ptr.hbm [resolvable:$true] %s888_s9 }
  0x36   : > { %702 = vmatmul.msk.f32.vlgmr.msra.gmra.mxu1 %vm354_vm0, %v332_v17  ;;  %712 = vmatmul.msk.f32.vlgmr.msra.gmra.mxu2 %vm354_vm0, %v332_v17  ;;  %s890_s30 = scalar_lea.hbm %s889_s9, 64  ;;  %p895_p7 = scmp.lt.s32.totalorder %s889_s9, %s1214_s4 }
  0x37   : > { %714 = vmatmul.msk.f32.vlgmr.msra.gmra.mxu3 %vm354_vm0, %v332_v17  ;;  %346 = vperm.xlu0 %813, %v334_v18   ;;  %p891_p4 = scmp.ne.s32.totalorder %s889_s9, %s890_s30  ;;  %p896_p8 = scmp.lt.s32.totalorder %s894_s29, %s890_s30 }
  0x39   : > { %p892_p5 = pnand %p891_p4, %p1049_p9  ;;  %p897_p10 = por %p896_p8, %p895_p7 }
  0x3b   : > { %p893_p6 = pneg %p892_p5 }
  0x3d   : > { %701 = vmatmul.msk.f32.gmra.mxu0 %vm354_vm0, %v333_v19  ;;  %p898_p13 = pnand %p897_p10, %p893_p6 }
  0x3e   : > { %703 = vmatmul.msk.f32.gmra.mxu1 %vm354_vm0, %v333_v19  ;;  %713 = vmatmul.msk.f32.gmra.mxu2 %vm354_vm0, %v333_v19 }
  0x3f   : > { %715 = vmatmul.msk.f32.gmra.mxu3 %vm354_vm0, %v333_v19  ;;  %351 = vperm.xlu0 %813, %v335_v20  }
  0xa9   : > { %v347_v21 = vpop.permute.xlu0 %346 }
  0xb1   : > { %v352_v30 = vpop.permute.xlu0 %351 }
  0xb2   : > { %v378_v22 = vpop.f32.mrf.mxu0 }
  0xb3   : > { %v401_v23 = vpop.f32.mrf.mxu1  ;;  %v379_v24 = vadd.f32 %v378_v22, %v347_v21 }
  0xb4   : > { %v402_v25 = vadd.f32 %v401_v23, %v347_v21 }
  0xb5   : > { %407 = vst [vmem:[%s1150_s13] sm:$0xff] %v379_v24  ;;  %v415_v28 = vsub.f32 %v379_v24, %v411_v26 }
  0xb6   : > { %408 = vst [vmem:[%s1150_s13 + $0x8] sm:$0xff] %v402_v25  ;;  %v416_v29 = vsub.f32 %v402_v25, %v412_v27 }
  0xb7   : > { %v419_v39 = vmul.f32 %v415_v28, %v415_v28 }
  0xb8   : > { %v420_v40 = vmul.f32 %v416_v29, %v416_v29 }
  0xb9   : > { %v462_v31 = vpop.f32.mrf.mxu2 }
  0xba   : > { %v485_v32 = vpop.f32.mrf.mxu3  ;;  %v463_v33 = vadd.f32 %v462_v31, %v347_v21  ;;  %v381_v35 = vpop.f32.mrf.mxu0  ;;  %v423_v50 = vadd.f32 %v420_v40, %v419_v39 }
  0xbb   : > { %v486_v34 = vadd.f32 %v485_v32, %v347_v21  ;;  %v404_v37 = vpop.f32.mrf.mxu1  ;;  %v382_v43 = vadd.f32 %v381_v35, %v352_v30 }
  0xbc   : > { %v405_v44 = vadd.f32 %v404_v37, %v352_v30  ;;  %716 = vst [vmem:[%s1150_s13 + $0x20] sm:$0xff] %v463_v33  ;;  %v501_v47 = vsub.f32 %v463_v33, %v720_v41 }
  0xbd   : > { %717 = vst [vmem:[%s1150_s13 + $0x28] sm:$0xff] %v486_v34  ;;  %v417_v45 = vsub.f32 %v382_v43, %v413_v36  ;;  %v502_v48 = vsub.f32 %v486_v34, %v721_v42 }
  0xbe   : > { %v418_v46 = vsub.f32 %v405_v44, %v414_v38  ;;  %409 = vst [vmem:[%s1150_s13 + $0x10] sm:$0xff] %v382_v43  ;;  %v505_v56 = vmul.f32 %v501_v47, %v501_v47 }
  0xbf   : > { %v421_v49 = vmul.f32 %v417_v45, %v417_v45  ;;  %410 = vst [vmem:[%s1150_s13 + $0x18] sm:$0xff] %v405_v44  ;;  %v506_v57 = vmul.f32 %v502_v48, %v502_v48 }
  0xc0   : > { %v422_v54 = vmul.f32 %v418_v46, %v418_v46 }
  0xc1   : > { %v465_v51 = vpop.f32.mrf.mxu2  ;;  %v424_v55 = vadd.f32 %v423_v50, %v421_v49  ;;  %v509_v0 = vadd.f32 %v506_v57, %v505_v56 }
  0xc2   : > { %v488_v53 = vpop.f32.mrf.mxu3  ;;  %v466_v58 = vadd.f32 %v465_v51, %v352_v30 }
  0xc3   : > { %v489_v59 = vadd.f32 %v488_v53, %v352_v30  ;;  %v425_v61 = vadd.f32 %v424_v55, %v422_v54 }
  0xc4   : > { %718 = vst [vmem:[%s1150_s13 + $0x30] sm:$0xff] %v466_v58  ;;  %v503_v62 = vsub.f32 %v466_v58, %v722_v52 }
  0xc5   : > { %719 = vst [vmem:[%s1150_s13 + $0x38] sm:$0xff] %v489_v59  ;;  %v504_v63 = vsub.f32 %v489_v59, %v723_v60  ;;  %426 = vadd.xlane.f32.xlu1 %v425_v61 }
  0xc6   : > { %v507_v1 = vmul.f32 %v503_v62, %v503_v62 }
  0xc7   : > { %v508_v3 = vmul.f32 %v504_v63, %v504_v63 }
  0xc8   : > { %v510_v2 = vadd.f32 %v509_v0, %v507_v1 }
  0xca   : > { %v511_v4 = vadd.f32 %v510_v2, %v508_v3 }
  0xcd   : > { %512 = vadd.xlane.f32.xlu1 %v511_v4 }
  0xce   : > { %901 = shalt.err (!%p898_p13)
}
  0xcf   : > { %s965_s16 = smov 256   ;;  %s966_s11 = smov 16   ;;  %vm330_vm1 = vcmask 0   ;;  %v967_v19 = vmov 0.0  }
  0xd0   : > { %744 = dma.vmem_to_hbm [thread:$0]  (%p1049_p9), %s547_s28, 1024, %s549_s0, %s528_s26, %s965_s16, %s965_s16, %s966_s11  }
  0xd1   : > { %p323_p0 = scmp.lt.s32.totalorder %s952_s21, 1 }
  0xd3   : > { %s1235_s21 = smov (!%p323_p0, %s952_s21), 1 }
  0xd4   : > { %s325_s13 = scalar_lea.vmem %s1215_s5, %s1235_s21 }
  0xd5   : > { %331 = vst.msk [vmem:[%s325_s13] sm:$0x1] %vm330_vm1, %v967_v19 }
  0xdc   : > { %v522_v20 = vld [vmem:[%s325_s13] sm:$0x1] }
 0x138   : > { %v427_v5 = vpop.xlane.xlu1 %426 }
 0x139   : > { %v428_v6 = vrot.slane %v427_v5, 4 }
 0x13b   : > { %v429_v7 = vadd.f32 %v428_v6, %v427_v5 }
 0x13d   : > { %v430_v8 = vrot.slane %v429_v7, 2 }
 0x13f   : > { %v431_v9 = vadd.f32 %v430_v8, %v429_v7 }
 0x140   : > { %v513_v10 = vpop.xlane.xlu1 %512 }
 0x141   : > { %v514_v11 = vrot.slane %v513_v10, 4  ;;  %v432_v12 = vrot.slane %v431_v9, 1 }
 0x143   : > { %v515_v13 = vadd.f32 %v514_v11, %v513_v10  ;;  %v433_v14 = vadd.f32 %v432_v12, %v431_v9 }
 0x145   : > { %v516_v15 = vrot.slane %v515_v13, 2  ;;  %736 = vpush %v433_v14 }
 0x147   : > { %v517_v16 = vadd.f32 %v516_v15, %v515_v13 }
 0x149   : > { %v518_v17 = vrot.slane %v517_v16, 1 }
 0x14b   : > { %v519_v18 = vadd.f32 %v518_v17, %v517_v16 }
 0x14d   : > { %738 = vpush %v519_v18 }
 0x176   : > { %s737_s28 = spop %736 }
 0x17e   : > { %s739_s14 = spop %738 }
 0x17f   : > { %s521_s15 = sadd.f32 %s739_s14, %s737_s28 }
 0x181   : > { %v523_v21 = vstv %s521_s15 }
 0x182   : > { %v524_v22 = vadd.f32 %v523_v21, %v522_v20 }
 0x184   : > { %526 = vst.msk [vmem:[%s325_s13] sm:$0x1] %vm330_vm1, %v524_v22 }
 0x185 PF: > { %s566_s17 = sand.u32 1, %s940_s18   ;;  %p754_p9 = pnand %p687_p12, %p1056_p11 }
 0x186   : > { %s567_s21 = scalar_lea.sflag [#allocation4], %s566_s17 }
 0x187   : > { %p755_p1 = pneg %p754_p9 }
 0x189   : > { %935 = dma.done.wait (%p755_p1), %s567_s21, 1024  }
 0x18a   : > { %937 = vsyncadd (%p755_p1), %s567_s21, 4294966272  ;;  %s25_s23 = sadd.s32 1, %s960_s23   ;;  %s1227_s21 = sld [smem:[#allocation11_spill]] }
 0x18b   : > { %p22_p2 = scmp.ge.s32.totalorder %s25_s23, 4   ;;  %s1228_s22 = sld [smem:[#allocation12_spill]] }
 0x18c   : > { %s1229_s18 = smov %s944_s19  ;;  %s1230_s19 = smov %s948_s20 }
 0x18d   : > { %s1231_s20 = smov %s1054_s7  ;;  %24 = sbr.rel (!%p22_p2) target bundleno = 10 (0xa), region = 113 }
 0x192   :  { %579 = vsyncpa [#allocation3], 1 }
 0x193   :  { %581 = vsyncpa [#allocation3 + $0x1], 1 }
 0x194   :  { %582 = vsyncpa [#allocation6], 1 }
 0x195   :  { %584 = vsyncpa [#allocation6 + $0x1], 1 }
 0x196   :  { %585 = vsyncpa [#allocation4], 1 }
 0x197   :  { %587 = vsyncpa [#allocation4 + $0x1], 1 }

</bundles_post_ra>
